<compile_context>
chip_gen: v6e
topology: v6e:2x2x1
jax: 0.10.0
libtpu: 0.0.40
codegen_flags: <defaults>
</compile_context>

<pallas_src>
import functools

import jax
import jax.numpy as jnp
from jax.experimental import pallas as pl
from jax.experimental.pallas import tpu as pltpu


# Scoped VMEM budget.  Tiles below are sized so that (2x double-buffered
# inputs + output + accumulator) stays far under this on all of v5e/v6e/v7x
# (v7x has only 64 MiB physical VMEM per TensorCore).
_VMEM_LIMIT = 32 * 1024 * 1024


# ----------------------------------------------------------------------------
# Tiled linear kernels
# ----------------------------------------------------------------------------

def _matmul_kernel(x_ref, w_ref, o_ref, acc_ref):
    @pl.when(pl.program_id(2) == 0)
    def _init():
        acc_ref[...] = jnp.zeros_like(acc_ref)

    acc_ref[...] += jnp.dot(x_ref[...], w_ref[...],
                            preferred_element_type=jnp.float32)

    @pl.when(pl.program_id(2) == pl.num_programs(2) - 1)
    def _store():
        o_ref[...] = acc_ref[...].astype(o_ref.dtype)


def _matmul_bias_kernel(x_ref, w_ref, b_ref, o_ref, acc_ref):
    @pl.when(pl.program_id(2) == 0)
    def _init():
        acc_ref[...] = jnp.zeros_like(acc_ref)

    acc_ref[...] += jnp.dot(x_ref[...], w_ref[...],
                            preferred_element_type=jnp.float32)

    @pl.when(pl.program_id(2) == pl.num_programs(2) - 1)
    def _store():
        # Bias add fused into the matmul epilogue (one HBM pass saved).
        o_ref[...] = (acc_ref[...] + b_ref[...].astype(jnp.float32)
                      ).astype(o_ref.dtype)


def _pick_tile(dim, candidates):
    """Largest candidate tile that evenly divides `dim`, else the full extent
    (a full-extent block is always layout-legal)."""
    for cand in candidates:
        if dim >= cand and dim % cand == 0:
            return cand
    return dim


def linear(x, w, b=None):
    """x: (..., K) @ w: (K, N) (+ b: (N,)) -> (..., N), tiled on the MXU."""
    orig_shape = x.shape
    K = orig_shape[-1]
    N = w.shape[1]
    M = 1
    for s in orig_shape[:-1]:
        M *= s
    x2 = x.reshape(M, K)

    # Second-to-last block dims need %8 (or full extent); last dims need %128
    # (or full extent).  Candidates satisfy both; fallback is the full extent.
    bm = _pick_tile(M, (256, 128, 8))
    bn = _pick_tile(N, (256, 128))
    bk = _pick_tile(K, (512, 256, 128))
    grid = (M // bm, N // bn, K // bk)

    compiler_params = pltpu.CompilerParams(
        dimension_semantics=("parallel", "parallel", "arbitrary"),
        vmem_limit_bytes=_VMEM_LIMIT,
    )
    x_spec = pl.BlockSpec((bm, bk), lambda i, j, k: (i, k))
    w_spec = pl.BlockSpec((bk, bn), lambda i, j, k: (k, j))
    o_spec = pl.BlockSpec((bm, bn), lambda i, j, k: (i, j))
    scratch = [pltpu.VMEM((bm, bn), jnp.float32)]
    out_shape = jax.ShapeDtypeStruct((M, N), x.dtype)

    if b is None:
        out = pl.pallas_call(
            _matmul_kernel,
            grid=grid,
            out_shape=out_shape,
            in_specs=[x_spec, w_spec],
            out_specs=o_spec,
            scratch_shapes=scratch,
            compiler_params=compiler_params,
        )(x2, w)
    else:
        b2 = b.reshape(1, N)
        b_spec = pl.BlockSpec((1, bn), lambda i, j, k: (0, j))
        out = pl.pallas_call(
            _matmul_bias_kernel,
            grid=grid,
            out_shape=out_shape,
            in_specs=[x_spec, w_spec, b_spec],
            out_specs=o_spec,
            scratch_shapes=scratch,
            compiler_params=compiler_params,
        )(x2, w, b2)
    return out.reshape(orig_shape[:-1] + (N,))


# ----------------------------------------------------------------------------
# Attention kernels (heads fused on the lane dim; no HBM head transpose)
# ----------------------------------------------------------------------------

def _one_head_attention(q_h, k_h, v_h, scale):
    """q_h: (n, d), k_h/v_h: (m, d) in the input dtype -> (n, d) float32."""
    # Scale folded into q: an (n, d) multiply instead of an (n, m) one.
    q_h = q_h * scale
    # QK^T via transposed contraction — no explicit k.T materialized;
    # operands stay in the input dtype, accumulation in f32 on the MXU.
    sim = jax.lax.dot_general(q_h, k_h, (((1,), (1,)), ((), ())),
                              preferred_element_type=jnp.float32)
    sim = sim - jnp.max(sim, axis=-1, keepdims=True)
    p = jnp.exp(sim)
    # Deferred normalization: 1/l applied AFTER the PV matmul (an (n, d)
    # multiply), reciprocal on the EUP slot.
    inv_l = pl.reciprocal(jnp.sum(p, axis=-1, keepdims=True), approx=True)
    out = jax.lax.dot_general(p.astype(v_h.dtype), v_h,
                              (((1,), (0,)), ((), ())),
                              preferred_element_type=jnp.float32)
    return out * inv_l


def _attn_self_kernel(qkv_ref, o_ref, *, heads, dim_head, scale):
    # qkv_ref: (1, n, 3*inner) fused [q | k | v]; o_ref: (1, n, inner).
    inner = heads * dim_head
    for h in range(heads):
        lo = h * dim_head
        q_h = qkv_ref[0, :, lo:lo + dim_head]
        k_h = qkv_ref[0, :, inner + lo:inner + lo + dim_head]
        v_h = qkv_ref[0, :, 2 * inner + lo:2 * inner + lo + dim_head]
        o_ref[0, :, lo:lo + dim_head] = _one_head_attention(
            q_h, k_h, v_h, scale).astype(o_ref.dtype)


def _attn_cross_kernel(q_ref, kv_ref, o_ref, *, heads, dim_head, scale):
    # q_ref: (1, n, inner); kv_ref: (1, m, 2*inner) fused [k | v].
    inner = heads * dim_head
    for h in range(heads):
        lo = h * dim_head
        q_h = q_ref[0, :, lo:lo + dim_head]
        k_h = kv_ref[0, :, lo:lo + dim_head]
        v_h = kv_ref[0, :, inner + lo:inner + lo + dim_head]
        o_ref[0, :, lo:lo + dim_head] = _one_head_attention(
            q_h, k_h, v_h, scale).astype(o_ref.dtype)


def _attention_self(qkv, heads, dim_head, scale, out_dtype):
    """qkv: (B, n, 3*inner) -> (B, n, inner); grid over batch (megacore)."""
    B, n, three_inner = qkv.shape
    inner = heads * dim_head
    # TODO(synk): for long sequences, switch to a flash-style kv-tiled grid
    # axis with online-softmax scratch so full K/V never co-resides in VMEM.
    return pl.pallas_call(
        functools.partial(_attn_self_kernel, heads=heads, dim_head=dim_head,
                          scale=scale),
        grid=(B,),
        out_shape=jax.ShapeDtypeStruct((B, n, inner), out_dtype),
        in_specs=[pl.BlockSpec((1, n, three_inner), lambda b: (b, 0, 0))],
        out_specs=pl.BlockSpec((1, n, inner), lambda b: (b, 0, 0)),
        compiler_params=pltpu.CompilerParams(
            dimension_semantics=("parallel",),
            vmem_limit_bytes=_VMEM_LIMIT),
    )(qkv)


def _attention_cross(q, kv, heads, dim_head, scale, out_dtype):
    """q: (B, n, inner), kv: (B, m, 2*inner) -> (B, n, inner)."""
    B, n, inner = q.shape
    m = kv.shape[1]
    return pl.pallas_call(
        functools.partial(_attn_cross_kernel, heads=heads, dim_head=dim_head,
                          scale=scale),
        grid=(B,),
        out_shape=jax.ShapeDtypeStruct((B, n, inner), out_dtype),
        in_specs=[pl.BlockSpec((1, n, inner), lambda b: (b, 0, 0)),
                  pl.BlockSpec((1, m, 2 * inner), lambda b: (b, 0, 0))],
        out_specs=pl.BlockSpec((1, n, inner), lambda b: (b, 0, 0)),
        compiler_params=pltpu.CompilerParams(
            dimension_semantics=("parallel",),
            vmem_limit_bytes=_VMEM_LIMIT),
    )(q, kv)


# ----------------------------------------------------------------------------
# CrossAttention forward (glue in plain JAX, hot paths in Pallas)
# ----------------------------------------------------------------------------

def cross_attention(x, params, context=None):
    """Forward pass of the PyTorch CrossAttention module.

    x: (B, n, query_dim); context: (B, m, context_dim) or None (self-attn).
    `mask` is unused in the reference forward; Dropout(p=0) is the identity.
    """
    heads, dim_head = params["heads"], params["dim_head"]
    scale = float(dim_head) ** -0.5

    if context is None:
        # Self-attention: fuse the three projections into one matmul over
        # concat(wq | wk | wv) — two fewer full HBM passes over x.
        w_qkv = jnp.concatenate([params["wq"], params["wk"], params["wv"]],
                                axis=1)
        qkv = linear(x, w_qkv)                      # (B, n, 3*inner)
        out = _attention_self(qkv, heads, dim_head, scale, x.dtype)
    else:
        w_kv = jnp.concatenate([params["wk"], params["wv"]], axis=1)
        q = linear(x, params["wq"])                 # (B, n, inner)
        kv = linear(context, w_kv)                  # (B, m, 2*inner)
        out = _attention_cross(q, kv, heads, dim_head, scale, x.dtype)

    # to_out = [Linear(inner, query_dim) (+bias, fused epilogue), Dropout(0)]
    return linear(out, params["wo"], params["bo"])


def cross_attention_ref(x, params, context=None):
    """Pure-JAX reference (mirrors the PyTorch forward) for validation."""
    heads, dim_head = params["heads"], params["dim_head"]
    scale = float(dim_head) ** -0.5
    ctx = x if context is None else context
    q = x @ params["wq"]
    k = ctx @ params["wk"]
    v = ctx @ params["wv"]
    B, n, inner = q.shape
    m = k.shape[1]

    def split(t, s):
        return t.reshape(B, s, heads, dim_head).transpose(0, 2, 1, 3)

    qh, kh, vh = split(q, n), split(k, m), split(v, m)
    sim = jnp.einsum("bhid,bhjd->bhij", qh, kh) * scale
    attn = jax.nn.softmax(sim, axis=-1)
    o = jnp.einsum("bhij,bhjd->bhid", attn, vh)
    o = o.transpose(0, 2, 1, 3).reshape(B, n, inner)
    return o @ params["wo"] + params["bo"]


def init_params(key, query_dim, context_dim, heads, dim_head):
    inner = heads * dim_head
    ctx_dim = query_dim if context_dim is None else context_dim
    k1, k2, k3, k4, k5 = jax.random.split(key, 5)

    def w(k, shape, fan_in):
        bound = float(fan_in) ** -0.5
        return jax.random.uniform(k, shape, jnp.float32, -bound, bound)

    return {
        "heads": heads,
        "dim_head": dim_head,
        "wq": w(k1, (query_dim, inner), query_dim),     # to_q (bias=False)
        "wk": w(k2, (ctx_dim, inner), ctx_dim),         # to_k (bias=False)
        "wv": w(k3, (ctx_dim, inner), ctx_dim),         # to_v (bias=False)
        "wo": w(k4, (inner, query_dim), inner),         # to_out[0] weight
        "bo": w(k5, (query_dim,), inner),               # to_out[0] bias
    }


if __name__ == "__main__":
    # Small shapes consistent with the module's (b, n, c) forward.
    B, N_Q, QUERY_DIM = 2, 8, 32
    HEADS, DIM_HEAD = 2, 16            # inner_dim = 32
    N_CTX, CONTEXT_DIM = 16, 48        # cross-attention context

    key = jax.random.PRNGKey(0)
    kx, kc, kp = jax.random.split(key, 3)
    x = jax.random.normal(kx, (B, N_Q, QUERY_DIM), dtype=jnp.float32)
    context = jax.random.normal(kc, (B, N_CTX, CONTEXT_DIM), dtype=jnp.float32)

    params_self = init_params(kp, QUERY_DIM, None, HEADS, DIM_HEAD)
    params_cross = init_params(kp, QUERY_DIM, CONTEXT_DIM, HEADS, DIM_HEAD)

    out_self = jax.block_until_ready(cross_attention(x, params_self))
    out_cross = jax.block_until_ready(cross_attention(x, params_cross, context))

    assert out_self.shape == (B, N_Q, QUERY_DIM), out_self.shape
    assert out_cross.shape == (B, N_Q, QUERY_DIM), out_cross.shape
    assert bool(jnp.all(jnp.isfinite(out_self)))
    assert bool(jnp.all(jnp.isfinite(out_cross)))

    # Validate against the pure-JAX reference (tolerance covers the approx
    # reciprocal in the softmax normalization).
    ref_self = cross_attention_ref(x, params_self)
    ref_cross = cross_attention_ref(x, params_cross, context)
    assert bool(jnp.allclose(out_self, ref_self, rtol=1e-2, atol=1e-2))
    assert bool(jnp.allclose(out_cross, ref_cross, rtol=1e-2, atol=1e-2))

    print("KERNEL_OK")
</pallas_src>

<mosaic_0001>
module attributes {stable_mosaic.version = 11 : i64} {
  func.func @_matmul_kernel(%arg0: i32, %arg1: i32, %arg2: i32, %arg3: memref<8x32xf32, #tpu.memory_space<vmem>>, %arg4: memref<32x96xf32, #tpu.memory_space<vmem>>, %arg5: memref<8x96xf32, #tpu.memory_space<vmem>>, %arg6: memref<8x96xf32, #tpu.memory_space<vmem>>) attributes {dimension_semantics = [#tpu.dimension_semantics<parallel>, #tpu.dimension_semantics<parallel>, #tpu.dimension_semantics<arbitrary>], iteration_bounds = array<i64: 2, 1, 1>, scalar_prefetch = 0 : i64, scratch_operands = 1 : i64, tpu.core_type = #tpu.core_type<tc>, window_params = [{transform_indices = @transform_0, window_bounds = array<i64: 8, 32>}, {transform_indices = @transform_1, window_bounds = array<i64: 32, 96>}, {transform_indices = @transform_2, window_bounds = array<i64: 8, 96>}]} {
    %c0_i32 = arith.constant 0 : i32
    %0 = arith.cmpi eq, %arg2, %c0_i32 : i32
    %1 = arith.extui %0 : i1 to i32
    %c0_i32_0 = arith.constant 0 : i32
    %2 = arith.cmpi ne, %1, %c0_i32_0 : i32
    scf.if %2 {
      %cst_10 = arith.constant 0.000000e+00 : f32
      %12 = vector.broadcast %cst_10 : f32 to vector<8x96xf32>
      %c0_11 = arith.constant 0 : index
      %c0_12 = arith.constant 0 : index
      %13 = vector.load %arg6[%c0_11, %c0_12] : memref<8x96xf32, #tpu.memory_space<vmem>>, vector<8x96xf32>
      tpu.vector_store %arg6[%c0_11, %c0_12], %12 {strides = array<i32>} : memref<8x96xf32, #tpu.memory_space<vmem>>, vector<8x96xf32>,
    } else {
    }
    %c0 = arith.constant 0 : index
    %c0_1 = arith.constant 0 : index
    %3 = vector.load %arg6[%c0, %c0_1] : memref<8x96xf32, #tpu.memory_space<vmem>>, vector<8x96xf32>
    %c0_2 = arith.constant 0 : index
    %c0_3 = arith.constant 0 : index
    %4 = vector.load %arg3[%c0_2, %c0_3] : memref<8x32xf32, #tpu.memory_space<vmem>>, vector<8x32xf32>
    %c0_4 = arith.constant 0 : index
    %c0_5 = arith.constant 0 : index
    %5 = vector.load %arg4[%c0_4, %c0_5] : memref<32x96xf32, #tpu.memory_space<vmem>>, vector<32x96xf32>
    %cst = arith.constant dense<0.000000e+00> : vector<8x96xf32>
    %6 = tpu.matmul %4, %5, %cst {dimension_numbers = #tpu.dot_dimension_numbers<[1], [0], [0], [1], [0, 0, 1, 1], [], []>} : vector<8x32xf32>, vector<32x96xf32>, vector<8x96xf32> -> vector<8x96xf32>
    %7 = arith.addf %3, %6 : vector<8x96xf32>
    %c0_6 = arith.constant 0 : index
    %c0_7 = arith.constant 0 : index
    %8 = vector.load %arg6[%c0_6, %c0_7] : memref<8x96xf32, #tpu.memory_space<vmem>>, vector<8x96xf32>
    tpu.vector_store %arg6[%c0_6, %c0_7], %7 {strides = array<i32>} : memref<8x96xf32, #tpu.memory_space<vmem>>, vector<8x96xf32>,
    %c0_i32_8 = arith.constant 0 : i32
    %9 = arith.cmpi eq, %arg2, %c0_i32_8 : i32
    %10 = arith.extui %9 : i1 to i32
    %c0_i32_9 = arith.constant 0 : i32
    %11 = arith.cmpi ne, %10, %c0_i32_9 : i32
    scf.if %11 {
      %c0_10 = arith.constant 0 : index
      %c0_11 = arith.constant 0 : index
      %12 = vector.load %arg6[%c0_10, %c0_11] : memref<8x96xf32, #tpu.memory_space<vmem>>, vector<8x96xf32>
      %c0_12 = arith.constant 0 : index
      %c0_13 = arith.constant 0 : index
      %13 = vector.load %arg5[%c0_12, %c0_13] : memref<8x96xf32, #tpu.memory_space<vmem>>, vector<8x96xf32>
      tpu.vector_store %arg5[%c0_12, %c0_13], %12 {strides = array<i32>} : memref<8x96xf32, #tpu.memory_space<vmem>>, vector<8x96xf32>,
    } else {
    }
    return
  }
  func.func @transform_0(%arg0: i32, %arg1: i32, %arg2: i32) -> (i32, i32) {
    %c0_i32 = arith.constant 0 : i32
    return %arg0, %arg2 : i32, i32
  }
  func.func @transform_1(%arg0: i32, %arg1: i32, %arg2: i32) -> (i32, i32) {
    %c0_i32 = arith.constant 0 : i32
    return %arg2, %arg1 : i32, i32
  }
  func.func @transform_2(%arg0: i32, %arg1: i32, %arg2: i32) -> (i32, i32) {
    %c0_i32 = arith.constant 0 : i32
    return %arg0, %arg1 : i32, i32
  }
}

</mosaic_0001>

<bundles_post_ra>
// kernel: tpu_custom_call.1
= control target key start
LH: loop header
LB: loop body
LE: loop exit
PB: predicated region body
PF: predicated region fallthrough
CT: control target
= control target key end

     0   :  { %7 = vsyncpa [#allocation4], 0  ;;  %s867_s0 = inlined_call_operand.hbm [shape: f32[16,32], index: 0, kind: input, shape index: {}]   ;;  %s868_s1 = inlined_call_operand.hbm [shape: f32[32,96], index: 1, kind: input, shape index: {}]   ;;  %s869_s2 = inlined_call_operand.hbm [shape: f32[16,96], index: 2, kind: output, shape index: {}]  }
   0x1   :  { %9 = vsyncpa [#allocation4 + $0x1], 0 }
   0x2   :  { %10 = vsyncpa [#allocation7], 0 }
   0x3   :  { %11 = vsyncpa [#allocation5], 0 }
   0x4   :  { %13 = vsyncpa [#allocation5 + $0x1], 0  ;;  %s687_s9 = smov 0   ;;  %s689_s10 = smov 0  }
   0x5   :  { %s691_s11 = smov 0   ;;  %s693_s12 = smov 0  }
   0x6   :  { %s695_s13 = smov 0   ;;  %s697_s14 = smov 0  }
   0x7 LB: > { %s416_s15 = sadd.s32 4294967295, %s663_s14   ;;  %s417_s16 = sadd.s32 4294967294, %s663_s14   ;;  %s663_s14 = sphi %s697_s14, %s19_s14   ;;  %s659_s13 = sphi %s695_s13, %s887_s13   ;;  %s655_s12 = sphi %s693_s12, %s886_s12   ;;  %s651_s11 = sphi %s691_s11, %s885_s11   ;;  %s647_s10 = sphi %s689_s10, %s884_s10   ;;  %s643_s9 = sphi %s687_s9, %s883_s9  }
   0x8   : > { %p60_p0 = scmp.ne.s32.totalorder %s647_s10, %s643_s9  ;;  %p721_p1 = scmp.eq.s32.totalorder %s416_s15, 0 }
   0x9   : > { %p725_p2 = scmp.eq.s32.totalorder %s416_s15, 1  ;;  %p120_p3 = scmp.eq.s32.totalorder %s417_s16, 1 }
   0xa   : > { %p731_p4 = por %p721_p1, %p60_p0  ;;  %p418_p5 = scmp.ge.s32.totalorder %s663_s14, 1 }
   0xb   : > { %p736_p6 = por %p120_p3, %p60_p0  ;;  %p127_p7 = scmp.lt.s32.totalorder %s663_s14, 3 }
   0xc   : > { %s873_s19 = scalar_select %p731_p4, 1, 0 }
   0xd   : > { %s874_s20 = scalar_select %p736_p6, 1, 0 }
   0xe   : > { %p741_p8 = pnand %p418_p5, %p127_p7  ;;  %s665_s22 = smov [#allocation6]  }
   0xf   : > { %s143_s23 = sshll.u32 %s665_s22, 4  ;;  %s38_s25 = sadd.s32 1, %s659_s13  ;;  %s144_s23 = int_to_ptr.vmem [resolvable:$true] %s143_s23 }
  0x10   : > { %p456_p9 = pneg %p741_p8  ;;  %s536_s26 = scalar_lea.vmem %s144_s23, 512 }
  0x11   : > { %p537_p13 = scmp.ne.s32.totalorder %s144_s23, %s536_s26  ;;  %p544_p5 = scmp.lt.s32.totalorder %s144_s23, %s144_s23 }
  0x12   : > { %p750_p11 = pnand %p456_p9, %p721_p1  ;;  %p545_p7 = scmp.lt.s32.totalorder %s536_s26, %s536_s26 }
  0x14   : > { %p527_p12 = pneg %p750_p11  ;;  %p546_p6 = por %p545_p7, %p544_p5 }
  0x16   : > { %p539_p0 = pnand %p537_p13, %p527_p12 }
  0x18   : > { %p540_p3 = pneg %p539_p0 }
  0x1a   : > { %p547_p4 = pnand %p546_p6, %p540_p3 }
  0x1c   : > { %550 = shalt.err (!%p547_p4)
}
  0x1d   : > { %s666_s27 = smov 128   ;;  %s667_s28 = smov 8  }
  0x1e   : > { %459 = dma.hbm_to_vmem [thread:$0]  (!%p750_p11), %s868_s1, 512, %s144_s23, [#allocation7], %s666_s27, %s666_s27, %s667_s28  }
  0x1f   : > { %p40_p6 = scmp.ge.s32.totalorder %s38_s25, 2  ;;  %s47_s3 = sadd.s32 1, %s651_s11 }
  0x20   : > { %p54_p4 = scmp.ne.s32.totalorder %s651_s11, %s647_s10  ;;  %p55_p9 = scmp.eq.s32.totalorder %s663_s14, 0 }
  0x21   : > { %s889_s25 = smov (%p40_p6, %s38_s25), 0  ;;  %p469_p0 = scmp.lt.s32.totalorder %s663_s14, 2 }
  0x22   : > { %p768_p12 = por %p55_p9, %p54_p4  ;;  %p774_p13 = por %p725_p2, %p54_p4 }
  0x23   : > { %s42_s6 = ssub.s32 %s659_s13, %s889_s25  ;;  %s157_s7 = sand.u32 1, %s651_s11  }
  0x24   : > { %p45_p11 = scmp.eq.s32.totalorder %s42_s6, 0  ;;  %s421_s8 = sshll.u32 %s157_s7, 3 }
  0x25   : > { %s422_s16 = sshll.u32 %s659_s13, 7  ;;  %s161_s26 = scalar_lea.vmem [#allocation3], %s421_s8 }
  0x26   : > { %s783_s15 = scalar_select %p45_p11, %s651_s11, %s47_s3  }
  0x27   : > { %s167_s24 = scalar_lea.hbm %s867_s0, %s422_s16  ;;  %s169_s27 = sshll.u32 %s161_s26, 4  ;;  %s170_s27 = int_to_ptr.vmem [resolvable:$true] %s169_s27 }
  0x28   : > { %p791_p2 = pnand %p469_p0, %p768_p12  ;;  %s158_s28 = scalar_lea.sflag [#allocation4], %s157_s7 }
  0x29   : > { %s564_s29 = scalar_lea.vmem %s170_s27, 128  ;;  %s668_s30 = smov [#allocation3]  }
  0x2a   : > { %p553_p3 = pneg %p791_p2  ;;  %p565_p5 = scmp.ne.s32.totalorder %s170_s27, %s564_s29 }
  0x2b   : > { %s569_s3 = sshll.u32 %s668_s30, 4  ;;  %s570_s3 = int_to_ptr.vmem [resolvable:$false] %s569_s3 }
  0x2c   : > { %p567_p7 = pnand %p565_p5, %p553_p3  ;;  %s571_s6 = scalar_lea.vmem %s570_s3, 256 }
  0x2d   : > { %p572_p4 = scmp.lt.s32.totalorder %s170_s27, %s570_s3  ;;  %p573_p9 = scmp.lt.s32.totalorder %s571_s6, %s564_s29 }
  0x2e   : > { %p568_p6 = pneg %p567_p7 }
  0x2f   : > { %p574_p11 = por %p573_p9, %p572_p4 }
  0x31   : > { %p575_p10 = pnand %p574_p11, %p568_p6 }
  0x33   : > { %578 = shalt.err (!%p575_p10)
}
  0x34   : > { %463 = dma.hbm_to_vmem [thread:$0]  (!%p791_p2), %s167_s24, 128, %s170_s27, %s158_s28  }
  0x35   : > { %178 = sbr.rel (%p741_p8) target bundleno = 286 (0x11e), region = 28  ;;  %s802_s4 = sand.u32 (!%p741_p8), 1, %s647_s10  }
  0x36   : > { %s424_s7 = sshll.u32 (!%p741_p8), %s802_s4, 3  ;;  %s181_s8 = scalar_lea.sflag (!%p741_p8), [#allocation4], %s802_s4 }
  0x37   : > { %s184_s16 = scalar_lea.vmem (!%p741_p8), [#allocation3], %s424_s7  ;;  %p880_p12 = scmp.ne.s32.totalorder (!%p741_p8), %s873_s19, 0 }
  0x3a   : > { %630 = dma.done.wait (%p880_p12), %s181_s8, 128  }
  0x3b   : > { %632 = vsyncadd (%p880_p12), %s181_s8, 4294967168 }
  0x3c   : > { %634 = dma.done.wait (%p721_p1), [#allocation7], 512  }
  0x3d   : > { %636 = vsyncadd (%p721_p1), [#allocation7], 4294966784  ;;  %vm214_vm0 = vcmask 785408   ;;  %v669_v0 = vmov 0.0   ;;  %vm670_vm1 = vmmov 0   ;;  %v221_v1 = vld [vmem:[#allocation6 + $0x18] sm:$0xff] }
  0x3e   : > { %437 = vmatprep.subr.mxu0 %v669_v0  ;;  %445 = vmatprep.mubr.msk.f32.mxu0 %vm670_vm1, %v669_v0  ;;  %215 = vst.msk [vmem:[#allocation2] sm:$0xff] %vm214_vm0, %v669_v0  ;;  %v220_v2 = vld [vmem:[#allocation6 + $0x10] sm:$0xff]  ;;  %v219_v3 = vld [vmem:[#allocation6 + $0x8] sm:$0xff]  ;;  %v218_v4 = vld [vmem:[#allocation6] sm:$0xff]  ;;  %vm222_vm2 = vcmask 261120   ;;  %s429_s17 = sshll.u32 %s655_s12, 7 }
  0x3f   : > { %438 = vmatpush3.msra.mxu0 %v221_v1  ;;  %v217_v5 = vld [vmem:[%s184_s16] sm:$0xff]  ;;  %s208_s19 = scalar_lea.vmem [#allocation8], %s424_s7  ;;  %s824_s24 = scalar_lea.hbm %s869_s2, %s429_s17 }
  0x40   : > { %439 = vmatprep.subr.mxu0 %v669_v0  ;;  %s319_s21 = sshll.u32 %s208_s19, 4  ;;  %s305_s26 = scalar_lea.sflag [#allocation5], %s802_s4  ;;  %s320_s21 = int_to_ptr.vmem [resolvable:$true] %s319_s21 }
  0x41   : > { %440 = vmatpush3.msra.mxu0 %v220_v2  ;;  %s579_s27 = scalar_lea.vmem %s320_s21, 128  ;;  %s671_s18 = smov [#allocation8]  }
  0x42   : > { %441 = vmatprep.subr.mxu0 %v669_v0  ;;  %p580_p1 = scmp.ne.s32.totalorder %s320_s21, %s579_s27  ;;  %s583_s12 = sshll.u32 %s671_s18, 4  ;;  %s584_s12 = int_to_ptr.vmem [resolvable:$false] %s583_s12 }
  0x43   : > { %442 = vmatpush3.msra.mxu0 %v219_v3  ;;  %s585_s28 = scalar_lea.vmem %s584_s12, 256  ;;  %p586_p0 = scmp.lt.s32.totalorder %s320_s21, %s584_s12 }
  0x44   : > { %443 = vmatprep.subr.mxu0 %v669_v0  ;;  %p581_p8 = pnand %p580_p1, %p774_p13  ;;  %p587_p2 = scmp.lt.s32.totalorder %s585_s28, %s579_s27 }
  0x45   : > { %444 = vmatpush3.msra.mxu0 %v218_v4  ;;  %v216_v6 = vld [vmem:[#allocation2] sm:$0xff] }
  0x46   : > { %446 = vmatmul.mubr.msk.f32.vlgmr.msra.gmra.mxu0 %vm222_vm2, %v217_v5  ;;  %p582_p10 = pneg %p581_p8  ;;  %p588_p3 = por %p587_p2, %p586_p0 }
  0x48   : > { %p589_p5 = pnand %p588_p3, %p582_p10 }
 0x106   : > { %v292_v7 = vpop.f32.mrf.mxu0 }
 0x107   : > { %v296_v8 = vadd.f32 %v292_v7, %v216_v6 }
 0x108   : > { %v447_v9 = vpop.f32.mrf.mxu0 }
 0x109   : > { %298 = vst.msk [vmem:[#allocation2] sm:$0xff] %vm214_vm0, %v296_v8 }
 0x110   : > { %v302_v10 = vld [vmem:[#allocation2] sm:$0xff] }
 0x111   : > { %303 = vst.msk [vmem:[%s208_s19] sm:$0xff] %vm214_vm0, %v302_v10 }
 0x112   : > { %592 = shalt.err (!%p589_p5)
}
 0x113   : > { %s593_s29 = scalar_lea.hbm %s824_s24, 128  ;;  %s597_s6 = scalar_lea.hbm %s869_s2, 256 }
 0x114   : > { %p594_p7 = scmp.ne.s32.totalorder %s824_s24, %s593_s29  ;;  %p598_p9 = scmp.lt.s32.totalorder %s824_s24, %s869_s2 }
 0x115   : > { %p599_p11 = scmp.lt.s32.totalorder %s597_s6, %s593_s29 }
 0x116   : > { %p595_p6 = pnand %p594_p7, %p774_p13 }
 0x117   : > { %p600_p12 = por %p599_p11, %p598_p9 }
 0x118   : > { %p596_p4 = pneg %p595_p6 }
 0x11a   : > { %p601_p1 = pnand %p600_p12, %p596_p4 }
 0x11c   : > { %604 = shalt.err (!%p601_p1)
}
 0x11d   : > { %454 = dma.vmem_to_hbm [thread:$0]  (%p774_p13), %s320_s21, 128, %s824_s24, %s305_s26  }
 0x11e PF: > { %s331_s8 = sand.u32 1, %s643_s9   ;;  %p881_p8 = scmp.ne.s32.totalorder %s874_s20, 0 }
 0x11f   : > { %p882_p10 = scmp.ge.s32.totalorder %s663_s14, 2  ;;  %s332_s16 = scalar_lea.sflag [#allocation5], %s331_s8 }
 0x121   : > { %p465_p0 = pnand %p882_p10, %p881_p8 }
 0x123   : > { %p466_p2 = pneg %p465_p0 }
 0x125   : > { %638 = dma.done.wait (%p466_p2), %s332_s16, 128  }
 0x126   : > { %640 = vsyncadd (%p466_p2), %s332_s16, 4294967168  ;;  %s19_s14 = sadd.s32 1, %s663_s14   ;;  %s883_s9 = smov %s647_s10 }
 0x127   : > { %p16_p3 = scmp.ge.s32.totalorder %s19_s14, 4   ;;  %s884_s10 = smov %s651_s11 }
 0x128   : > { %s885_s11 = smov %s783_s15  ;;  %s886_s12 = smov %s659_s13 }
 0x129   : > { %s887_s13 = smov %s889_s25  ;;  %18 = sbr.rel (!%p16_p3) target bundleno = 7 (0x7), region = 86 }
 0x12e   :  { %337 = vsyncpa [#allocation4], 1 }
 0x12f   :  { %339 = vsyncpa [#allocation4 + $0x1], 1 }
 0x130   :  { %340 = vsyncpa [#allocation7], 1 }
 0x131   :  { %341 = vsyncpa [#allocation5], 1 }
 0x132   :  { %343 = vsyncpa [#allocation5 + $0x1], 1 }

</bundles_post_ra>
